<compile_context>
chip_gen: v6e
topology: v6e:2x2x1
jax: 0.10.0
libtpu: 0.0.40
codegen_flags: <defaults>
</compile_context>

<pallas_src>
import functools

import jax
import jax.numpy as jnp
from jax.experimental import pallas as pl
from jax.experimental.pallas import tpu as pltpu

_LANE = 128
_COL_TILE = 256            # grid-tiled column tile (multiple of 256 -> lane-dense band outputs)
_MAX_ROW_BLOCK = 1024      # cap on rows of the merged C*Hh axis per grid step


def _vmem_capacity_bytes():
    try:
        info = pltpu.get_tpu_info()
        cap = getattr(info, "vmem_capacity_bytes", None)
        if cap:
            return int(cap)
    except Exception:
        pass
    return 64 * 1024 * 1024   # conservative (v7x-sized) default


def _butterfly_matrix(wt, dtype=jnp.bfloat16):
    """M = [Sc | Dc], shape (wt, wt), entries 0/±0.5 (exactly representable in bf16).

    With r = even_row + odd_row and d = odd_row - even_row:
      r @ Sc = LL,  r @ Dc = HL,  d @ Sc = LH,  d @ Dc = HH.
    """
    wht = wt // 2
    row = jnp.arange(wt, dtype=jnp.int32)[:, None]
    col = jnp.arange(wt, dtype=jnp.int32)[None, :]
    pair = jnp.where(col < wht, col, col - wht)
    hit = (row // 2) == pair
    sign = jnp.where((col >= wht) & (row % 2 == 0), -0.5, 0.5)
    return jnp.where(hit, sign, 0.0).astype(dtype)


def _split_dot(a, m_bf16, n_terms):
    """a (f32) @ m (bf16, entries 0/±0.5) with n_terms bf16 MXU passes, f32 accumulation.

    m is exact in bf16 and |m| <= 0.5, so the only error is the residual of the n_terms-term
    bf16 decomposition of `a` (~2^-24 relative for n_terms=3) -- far cheaper than HIGHEST (6x).
    """
    acc = None
    rem = a
    for t in range(n_terms):
        hi = rem.astype(jnp.bfloat16)
        part = jnp.dot(hi, m_bf16, preferred_element_type=jnp.float32)
        acc = part if acc is None else acc + part
        if t + 1 < n_terms:
            rem = rem - hi.astype(jnp.float32)
    return acc


def _dwt_tiled_kernel(xe_ref, xo_ref, m_ref, o_ref, *, n_terms):
    # xe_ref / xo_ref: (1, g, Wt)  even-row / odd-row column tiles (same HBM array, disjoint slabs)
    # m_ref:           (Wt, Wt)    bf16 butterfly [Sc | Dc]
    # o_ref:           (1, 4, g, Wt//2)  band tiles LL, HL, LH, HH (lane-dense, Wt//2 >= 128)
    wht = o_ref.shape[-1]
    xe = xe_ref[0].astype(jnp.float32)
    xo = xo_ref[0].astype(jnp.float32)
    r = xe + xo                       # row-sum  -> LL | HL
    d = xo - xe                       # row-diff -> LH | HH
    m = m_ref[...]
    rm = _split_dot(r, m, n_terms)    # (g, Wt) = [LL | HL]
    dm = _split_dot(d, m, n_terms)    # (g, Wt) = [LH | HH]
    dt = o_ref.dtype
    o_ref[0, 0] = rm[:, :wht].astype(dt)
    o_ref[0, 1] = rm[:, wht:].astype(dt)
    o_ref[0, 2] = dm[:, :wht].astype(dt)
    o_ref[0, 3] = dm[:, wht:].astype(dt)


def _dwt_full_kernel(x_ref, m_ref, o_ref, *, n_terms, col_tile):
    # Fallback when W is not a multiple of 256: full-width merged rows, in-kernel column tiling.
    # x_ref: (1, g, 2*W) merged rows [even row | odd row];  m_ref: (col_tile, col_tile) bf16
    # o_ref: (1, 4, g, W//2)
    w = x_ref.shape[-1] // 2
    wht = col_tile // 2
    x = x_ref[0]
    xe = x[:, :w].astype(jnp.float32)
    xo = x[:, w:].astype(jnp.float32)
    r = xe + xo
    d = xo - xe
    m = m_ref[...]
    dt = o_ref.dtype
    for t in range(w // col_tile):          # static unroll over column-pair tiles
        c0 = t * col_tile
        rm = _split_dot(r[:, c0:c0 + col_tile], m, n_terms)
        dm = _split_dot(d[:, c0:c0 + col_tile], m, n_terms)
        o0 = t * wht
        o_ref[0, 0, :, o0:o0 + wht] = rm[:, :wht].astype(dt)
        o_ref[0, 1, :, o0:o0 + wht] = rm[:, wht:].astype(dt)
        o_ref[0, 2, :, o0:o0 + wht] = dm[:, :wht].astype(dt)
        o_ref[0, 3, :, o0:o0 + wht] = dm[:, wht:].astype(dt)


def _pick_col_tile(w):
    """Column tile for the fallback path (must divide W)."""
    if w <= _COL_TILE:
        return w
    for t in (256, 128):
        if w % t == 0:
            return t
    best = 0
    for t in range(2, _COL_TILE + 1, 2):
        if w % t == 0:
            best = t
    # TODO(synk): widths with no even divisor >= 64 below 256 fall back to a full-width
    # butterfly matrix (MXU work scales with W again for those rare shapes).
    return best if best >= 64 else w


def _pick_row_block(ch, row_bytes, budget):
    """Largest multiple-of-8 row block whose input slab fits `budget` (full CH if it all fits)."""
    if ch * row_bytes <= budget and ch <= _MAX_ROW_BLOCK:
        return ch
    g = max(8, (budget // max(row_bytes, 1)) // 8 * 8)
    return int(min(g, ch, _MAX_ROW_BLOCK))


def dwt_pallas(x, *, row_block=None):
    """x: (B, T, C, H, W) -> (B, T, 4, C, H//2, W//2), matching the PyTorch DWT module."""
    B, T, C, H, W = x.shape
    assert H % 2 == 0 and W % 2 == 0, "DWT requires even spatial dims"
    Hh, Wh = H // 2, W // 2
    BT, CH = B * T, C * Hh
    isz = jnp.dtype(x.dtype).itemsize
    n_terms = 3 if x.dtype == jnp.float32 else 2

    cap = _vmem_capacity_bytes()
    budget = (2 << 20) if cap <= (96 << 20) else (4 << 20)   # per-step input bytes

    # Free metadata reshape: each merged row = [row_2h | row_2h+1].
    xr = x.reshape(BT, CH, 2 * W)

    if W % (2 * _LANE) == 0:
        # ---- main path: grid-tiled columns (Wt = 256, Wht = 128 lane-dense outputs) ----
        Wt = _COL_TILE
        Wht = Wt // 2
        nk = W // Wt
        g = min(row_block, CH) if row_block else _pick_row_block(CH, 2 * Wt * isz, budget)
        nj = pl.cdiv(CH, g)
        m = _butterfly_matrix(Wt)
        kernel = functools.partial(_dwt_tiled_kernel, n_terms=n_terms)
        grid = (BT, nj, nk)
        in_specs = [
            pl.BlockSpec((1, g, Wt), lambda i, j, k: (i, j, k)),            # even-row columns
            pl.BlockSpec((1, g, Wt), lambda i, j, k, _nk=nk: (i, j, k + _nk)),  # odd-row columns
            pl.BlockSpec((Wt, Wt), lambda i, j, k: (0, 0)),                 # constant, resident
        ]
        out_specs = pl.BlockSpec((1, 4, g, Wht), lambda i, j, k: (i, 0, j, k))
        operands = (xr, xr, m)
        sem = ("parallel", "parallel", "parallel")
        in_block_bytes = 2 * g * Wt * isz
        out_block_bytes = 4 * g * Wht * isz
        col_tile = Wt
    else:
        # ---- fallback path: full-width merged rows, in-kernel column tiling ----
        col_tile = _pick_col_tile(W)
        g = min(row_block, CH) if row_block else _pick_row_block(CH, 2 * W * isz, budget)
        nj = pl.cdiv(CH, g)
        m = _butterfly_matrix(col_tile)
        kernel = functools.partial(_dwt_full_kernel, n_terms=n_terms, col_tile=col_tile)
        grid = (BT, nj)
        in_specs = [
            pl.BlockSpec((1, g, 2 * W), lambda i, j: (i, j, 0)),
            pl.BlockSpec((col_tile, col_tile), lambda i, j: (0, 0)),
        ]
        out_specs = pl.BlockSpec((1, 4, g, Wh), lambda i, j: (i, 0, j, 0))
        operands = (xr, m)
        sem = ("parallel", "parallel")
        in_block_bytes = g * 2 * W * isz
        out_block_bytes = 4 * g * Wh * isz

    # VMEM footprint: 2x double-buffered in/out blocks + M + f32/bf16 temporaries, clamped to the
    # chip's physical capacity (minus headroom) so v7x (64 MiB) never over-asks.
    m_bytes = int(m.size) * 2
    need = 2 * in_block_bytes + 2 * out_block_bytes + 2 * m_bytes + 3 * in_block_bytes + (4 << 20)
    vmem_limit = int(min(cap - (8 << 20), max(need, 32 << 20)))

    cost = pl.CostEstimate(
        flops=2 * n_terms * 4 * BT * CH * Wh * col_tile + 4 * x.size,  # <=3 bf16 MXU passes + VPU
        transcendentals=0,
        bytes_accessed=2 * x.size * isz,                               # read x once + write once
    )

    out = pl.pallas_call(
        kernel,
        out_shape=jax.ShapeDtypeStruct((BT, 4, CH, Wh), x.dtype),
        grid=grid,
        in_specs=in_specs,
        out_specs=out_specs,
        compiler_params=pltpu.CompilerParams(
            dimension_semantics=sem,
            vmem_limit_bytes=vmem_limit,
        ),
        cost_estimate=cost,
    )(*operands)

    # Free metadata reshape into the PyTorch output layout (no transpose pass).
    return out.reshape(B, T, 4, C, Hh, Wh)


def dwt_reference(x):
    """Pure-jnp transcription of the PyTorch forward, for verification."""
    x01 = x[:, :, :, 0::2, :] / 2
    x02 = x[:, :, :, 1::2, :] / 2
    x1 = x01[:, :, :, :, 0::2]
    x2 = x02[:, :, :, :, 0::2]
    x3 = x01[:, :, :, :, 1::2]
    x4 = x02[:, :, :, :, 1::2]
    x_ll = x1 + x2 + x3 + x4
    x_hl = -x1 - x2 + x3 + x4
    x_lh = -x1 + x2 - x3 + x4
    x_hh = x1 - x2 - x3 + x4
    return jnp.stack([x_ll, x_hl, x_lh, x_hh], axis=2)


if __name__ == "__main__":
    key = jax.random.PRNGKey(0)
    cases = [
        ((2, 3, 4, 16, 16), None),    # small W  -> fallback (full-width) path
        ((1, 2, 3, 20, 256), None),   # W % 256 == 0 -> grid-tiled column path
        ((1, 1, 3, 20, 512), 16),     # two column tiles + ragged (masked) last row block
    ]
    for shape, rb in cases:
        key, sub = jax.random.split(key)
        x = jax.random.normal(sub, shape, dtype=jnp.float32)
        out = jax.block_until_ready(dwt_pallas(x, row_block=rb))
        ref = dwt_reference(x)
        assert out.shape == ref.shape, (out.shape, ref.shape)
        max_err = float(jnp.max(jnp.abs(out - ref)))
        assert jnp.allclose(out, ref, atol=1e-5, rtol=1e-5), (shape, max_err)

    print("KERNEL_OK")
</pallas_src>

<mosaic_0001>
module attributes {stable_mosaic.version = 11 : i64} {
  func.func @_dwt_full_kernel(%arg0: i32, %arg1: i32, %arg2: memref<1x32x32xf32, #tpu.memory_space<vmem>>, %arg3: memref<16x16xbf16, #tpu.memory_space<vmem>>, %arg4: memref<1x4x32x8xf32, #tpu.memory_space<vmem>>) attributes {dimension_semantics = [#tpu.dimension_semantics<parallel>, #tpu.dimension_semantics<parallel>], iteration_bounds = array<i64: 6, 1>, scalar_prefetch = 0 : i64, scratch_operands = 0 : i64, tpu.core_type = #tpu.core_type<tc>, window_params = [{transform_indices = @transform_0, window_bounds = array<i64: 1, 32, 32>}, {pipeline_mode = #tpu.pipeline_mode<synchronous>, transform_indices = @transform_1, window_bounds = array<i64: 16, 16>}, {transform_indices = @transform_2, window_bounds = array<i64: 1, 4, 32, 8>}]} {
    %c0 = arith.constant 0 : index
    %c0_0 = arith.constant 0 : index
    %c0_1 = arith.constant 0 : index
    %0 = vector.load %arg2[%c0, %c0_0, %c0_1] : memref<1x32x32xf32, #tpu.memory_space<vmem>>, vector<1x32x32xf32>
    %1 = vector.shape_cast %0 : vector<1x32x32xf32> to vector<32x32xf32>
    %2 = vector.extract_strided_slice %1 {offsets = [0, 0], sizes = [32, 16], strides = [1, 1]} : vector<32x32xf32> to vector<32x16xf32>
    %3 = vector.extract_strided_slice %1 {offsets = [0, 16], sizes = [32, 16], strides = [1, 1]} : vector<32x32xf32> to vector<32x16xf32>
    %4 = arith.addf %2, %3 : vector<32x16xf32>
    %5 = arith.subf %3, %2 : vector<32x16xf32>
    %c0_2 = arith.constant 0 : index
    %c0_3 = arith.constant 0 : index
    %6 = vector.load %arg3[%c0_2, %c0_3] : memref<16x16xbf16, #tpu.memory_space<vmem>>, vector<16x16xbf16>
    %7 = arith.truncf %4 : vector<32x16xf32> to vector<32x16xbf16>
    %cst = arith.constant dense<0.000000e+00> : vector<32x16xf32>
    %8 = tpu.matmul %7, %6, %cst {dimension_numbers = #tpu.dot_dimension_numbers<[1], [0], [0], [1], [0, 0, 1, 1], [], []>} : vector<32x16xbf16>, vector<16x16xbf16>, vector<32x16xf32> -> vector<32x16xf32>
    %9 = arith.extf %7 : vector<32x16xbf16> to vector<32x16xf32>
    %10 = arith.subf %4, %9 : vector<32x16xf32>
    %11 = arith.truncf %10 : vector<32x16xf32> to vector<32x16xbf16>
    %cst_4 = arith.constant dense<0.000000e+00> : vector<32x16xf32>
    %12 = tpu.matmul %11, %6, %cst_4 {dimension_numbers = #tpu.dot_dimension_numbers<[1], [0], [0], [1], [0, 0, 1, 1], [], []>} : vector<32x16xbf16>, vector<16x16xbf16>, vector<32x16xf32> -> vector<32x16xf32>
    %13 = arith.addf %8, %12 : vector<32x16xf32>
    %14 = arith.extf %11 : vector<32x16xbf16> to vector<32x16xf32>
    %15 = arith.subf %10, %14 : vector<32x16xf32>
    %16 = arith.truncf %15 : vector<32x16xf32> to vector<32x16xbf16>
    %cst_5 = arith.constant dense<0.000000e+00> : vector<32x16xf32>
    %17 = tpu.matmul %16, %6, %cst_5 {dimension_numbers = #tpu.dot_dimension_numbers<[1], [0], [0], [1], [0, 0, 1, 1], [], []>} : vector<32x16xbf16>, vector<16x16xbf16>, vector<32x16xf32> -> vector<32x16xf32>
    %18 = arith.addf %13, %17 : vector<32x16xf32>
    %19 = arith.truncf %5 : vector<32x16xf32> to vector<32x16xbf16>
    %cst_6 = arith.constant dense<0.000000e+00> : vector<32x16xf32>
    %20 = tpu.matmul %19, %6, %cst_6 {dimension_numbers = #tpu.dot_dimension_numbers<[1], [0], [0], [1], [0, 0, 1, 1], [], []>} : vector<32x16xbf16>, vector<16x16xbf16>, vector<32x16xf32> -> vector<32x16xf32>
    %21 = arith.extf %19 : vector<32x16xbf16> to vector<32x16xf32>
    %22 = arith.subf %5, %21 : vector<32x16xf32>
    %23 = arith.truncf %22 : vector<32x16xf32> to vector<32x16xbf16>
    %cst_7 = arith.constant dense<0.000000e+00> : vector<32x16xf32>
    %24 = tpu.matmul %23, %6, %cst_7 {dimension_numbers = #tpu.dot_dimension_numbers<[1], [0], [0], [1], [0, 0, 1, 1], [], []>} : vector<32x16xbf16>, vector<16x16xbf16>, vector<32x16xf32> -> vector<32x16xf32>
    %25 = arith.addf %20, %24 : vector<32x16xf32>
    %26 = arith.extf %23 : vector<32x16xbf16> to vector<32x16xf32>
    %27 = arith.subf %22, %26 : vector<32x16xf32>
    %28 = arith.truncf %27 : vector<32x16xf32> to vector<32x16xbf16>
    %cst_8 = arith.constant dense<0.000000e+00> : vector<32x16xf32>
    %29 = tpu.matmul %28, %6, %cst_8 {dimension_numbers = #tpu.dot_dimension_numbers<[1], [0], [0], [1], [0, 0, 1, 1], [], []>} : vector<32x16xbf16>, vector<16x16xbf16>, vector<32x16xf32> -> vector<32x16xf32>
    %30 = arith.addf %25, %29 : vector<32x16xf32>
    %31 = vector.extract_strided_slice %18 {offsets = [0, 0], sizes = [32, 8], strides = [1, 1]} : vector<32x16xf32> to vector<32x8xf32>
    %c0_9 = arith.constant 0 : index
    %c0_10 = arith.constant 0 : index
    %c0_11 = arith.constant 0 : index
    %c0_12 = arith.constant 0 : index
    %32 = vector.load %arg4[%c0_9, %c0_10, %c0_11, %c0_12] : memref<1x4x32x8xf32, #tpu.memory_space<vmem>>, vector<1x1x32x8xf32>
    %33 = vector.shape_cast %32 : vector<1x1x32x8xf32> to vector<32x8xf32>
    %34 = vector.shape_cast %31 : vector<32x8xf32> to vector<1x1x32x8xf32>
    tpu.vector_store %arg4[%c0_9, %c0_10, %c0_11, %c0_12], %34 {strides = array<i32>} : memref<1x4x32x8xf32, #tpu.memory_space<vmem>>, vector<1x1x32x8xf32>,
    %35 = vector.extract_strided_slice %18 {offsets = [0, 8], sizes = [32, 8], strides = [1, 1]} : vector<32x16xf32> to vector<32x8xf32>
    %c0_13 = arith.constant 0 : index
    %c1 = arith.constant 1 : index
    %c0_14 = arith.constant 0 : index
    %c0_15 = arith.constant 0 : index
    %36 = vector.load %arg4[%c0_13, %c1, %c0_14, %c0_15] : memref<1x4x32x8xf32, #tpu.memory_space<vmem>>, vector<1x1x32x8xf32>
    %37 = vector.shape_cast %36 : vector<1x1x32x8xf32> to vector<32x8xf32>
    %38 = vector.shape_cast %35 : vector<32x8xf32> to vector<1x1x32x8xf32>
    tpu.vector_store %arg4[%c0_13, %c1, %c0_14, %c0_15], %38 {strides = array<i32>} : memref<1x4x32x8xf32, #tpu.memory_space<vmem>>, vector<1x1x32x8xf32>,
    %39 = vector.extract_strided_slice %30 {offsets = [0, 0], sizes = [32, 8], strides = [1, 1]} : vector<32x16xf32> to vector<32x8xf32>
    %c0_16 = arith.constant 0 : index
    %c2 = arith.constant 2 : index
    %c0_17 = arith.constant 0 : index
    %c0_18 = arith.constant 0 : index
    %40 = vector.load %arg4[%c0_16, %c2, %c0_17, %c0_18] : memref<1x4x32x8xf32, #tpu.memory_space<vmem>>, vector<1x1x32x8xf32>
    %41 = vector.shape_cast %40 : vector<1x1x32x8xf32> to vector<32x8xf32>
    %42 = vector.shape_cast %39 : vector<32x8xf32> to vector<1x1x32x8xf32>
    tpu.vector_store %arg4[%c0_16, %c2, %c0_17, %c0_18], %42 {strides = array<i32>} : memref<1x4x32x8xf32, #tpu.memory_space<vmem>>, vector<1x1x32x8xf32>,
    %43 = vector.extract_strided_slice %30 {offsets = [0, 8], sizes = [32, 8], strides = [1, 1]} : vector<32x16xf32> to vector<32x8xf32>
    %c0_19 = arith.constant 0 : index
    %c3 = arith.constant 3 : index
    %c0_20 = arith.constant 0 : index
    %c0_21 = arith.constant 0 : index
    %44 = vector.load %arg4[%c0_19, %c3, %c0_20, %c0_21] : memref<1x4x32x8xf32, #tpu.memory_space<vmem>>, vector<1x1x32x8xf32>
    %45 = vector.shape_cast %44 : vector<1x1x32x8xf32> to vector<32x8xf32>
    %46 = vector.shape_cast %43 : vector<32x8xf32> to vector<1x1x32x8xf32>
    tpu.vector_store %arg4[%c0_19, %c3, %c0_20, %c0_21], %46 {strides = array<i32>} : memref<1x4x32x8xf32, #tpu.memory_space<vmem>>, vector<1x1x32x8xf32>,
    return
  }
  func.func @transform_0(%arg0: i32, %arg1: i32) -> (i32, i32, i32) {
    %c0_i32 = arith.constant 0 : i32
    %c0_i32_0 = arith.constant 0 : i32
    return %arg0, %arg1, %c0_i32 : i32, i32, i32
  }
  func.func @transform_1(%arg0: i32, %arg1: i32) -> (i32, i32) {
    %c0_i32 = arith.constant 0 : i32
    %c0_i32_0 = arith.constant 0 : i32
    %c0_i32_1 = arith.constant 0 : i32
    return %c0_i32, %c0_i32_0 : i32, i32
  }
  func.func @transform_2(%arg0: i32, %arg1: i32) -> (i32, i32, i32, i32) {
    %c0_i32 = arith.constant 0 : i32
    %c0_i32_0 = arith.constant 0 : i32
    %c0_i32_1 = arith.constant 0 : i32
    return %arg0, %c0_i32, %arg1, %c0_i32_0 : i32, i32, i32, i32
  }
}

</mosaic_0001>

<bundles_post_ra>
// kernel: tpu_custom_call.1
= control target key start
LH: loop header
LB: loop body
LE: loop exit
PB: predicated region body
PF: predicated region fallthrough
CT: control target
= control target key end

     0   :  { %7 = vsyncpa [#allocation3], 0  ;;  %s1317_s0 = inlined_call_operand.hbm [shape: f32[6,32,32], index: 0, kind: input, shape index: {}]   ;;  %s1318_s1 = inlined_call_operand.hbm [shape: bf16[16,16], index: 1, kind: input, shape index: {}]   ;;  %s1319_s2 = inlined_call_operand.vmem [shape: f32[6,4,32,8], index: 2, kind: output, shape index: {}]  }
   0x1   :  { %9 = vsyncpa [#allocation3 + $0x1], 0 }
   0x2   :  { %10 = vsyncpa [#allocation5], 0  ;;  %s1118_s9 = smov 0   ;;  %s1120_s10 = smov 0  }
   0x3   :  { %s1122_s11 = smov 0   ;;  %s1124_s12 = smov 0  }
   0x4   :  { %s1126_s13 = smov 0   ;;  %s1128_s14 = smov 0  }
   0x5 LB: > { %s814_s15 = sadd.s32 4294967295, %s1092_s14   ;;  %p50_p0 = scmp.ne.s32.totalorder %s1076_s10, %s1072_s9  ;;  %s1092_s14 = sphi %s1128_s14, %s16_s14   ;;  %s1088_s13 = sphi %s1126_s13, %s1329_s13   ;;  %s1084_s12 = sphi %s1124_s12, %s1328_s12   ;;  %s1080_s11 = sphi %s1122_s11, %s1327_s11   ;;  %s1076_s10 = sphi %s1120_s10, %s1326_s10   ;;  %s1072_s9 = sphi %s1118_s9, %s1325_s9  }
   0x6   : > { %p1148_p1 = scmp.eq.s32.totalorder %s814_s15, 0  ;;  %p816_p2 = scmp.ge.s32.totalorder %s1092_s14, 1 }
   0x7   : > { %p110_p3 = scmp.lt.s32.totalorder %s1092_s14, 7  ;;  %s1094_s19 = smov [#allocation4]  }
   0x8   : > { %p1156_p4 = por %p1148_p1, %p50_p0  ;;  %s122_s20 = sshll.u32 %s1094_s19, 4  ;;  %s123_s20 = int_to_ptr.vmem [resolvable:$true] %s122_s20 }
   0x9   : > { %p1160_p5 = pnand %p816_p2, %p110_p3  ;;  %s28_s22 = sadd.s32 1, %s1088_s13 }
   0xa   : > { %s995_s23 = scalar_lea.vmem %s123_s20, 128  ;;  %p1003_p12 = scmp.lt.s32.totalorder %s123_s20, %s123_s20 }
   0xb   : > { %p916_p6 = pneg %p1160_p5  ;;  %p996_p9 = scmp.ne.s32.totalorder %s123_s20, %s995_s23 }
   0xc   : > { %p1004_p13 = scmp.lt.s32.totalorder %s995_s23, %s995_s23 }
   0xd   : > { %p1168_p7 = pnand %p916_p6, %p1148_p1 }
   0xe   : > { %p1005_p0 = por %p1004_p13, %p1003_p12 }
   0xf   : > { %p986_p8 = pneg %p1168_p7 }
  0x11   : > { %p998_p10 = pnand %p996_p9, %p986_p8 }
  0x13   : > { %p999_p11 = pneg %p998_p10 }
  0x15   : > { %p1006_p2 = pnand %p1005_p0, %p999_p11 }
  0x17   : > { %1009 = shalt.err (!%p1006_p2)
}
  0x18   : > { %s1095_s24 = smov 64   ;;  %s1096_s25 = smov 4  }
  0x19   : > { %919 = dma.hbm_to_vmem [thread:$0]  (!%p1168_p7), %s1318_s1, 128, %s123_s20, [#allocation5], %s1095_s24, %s1095_s24, %s1096_s25  }
  0x1a   : > { %p30_p3 = scmp.ge.s32.totalorder %s28_s22, 6  ;;  %s37_s28 = sadd.s32 1, %s1080_s11 }
  0x1b   : > { %p44_p6 = scmp.ne.s32.totalorder %s1080_s11, %s1076_s10  ;;  %p45_p8 = scmp.eq.s32.totalorder %s1092_s14, 0 }
  0x1c   : > { %s1331_s22 = smov (%p30_p3, %s28_s22), 0  ;;  %p925_p10 = scmp.lt.s32.totalorder %s1092_s14, 6 }
  0x1d   : > { %p46_p9 = por %p45_p8, %p44_p6  ;;  %s32_s29 = ssub.s32 %s1088_s13, %s1331_s22 }
  0x1e   : > { %s136_s30 = sand.u32 1, %s1080_s11   ;;  %p35_p11 = scmp.eq.s32.totalorder %s32_s29, 0 }
  0x1f   : > { %s819_s3 = sshll.u32 %s136_s30, 5  ;;  %s854_s4 = sshll.u32 %s1088_s13, 9 }
  0x20   : > { %s1192_s5 = scalar_select %p35_p11, %s1080_s11, %s37_s28  }
  0x21   : > { %s148_s8 = scalar_lea.hbm %s1317_s0, %s854_s4  ;;  %s140_s9 = scalar_lea.vmem [#allocation2], %s819_s3 }
  0x22   : > { %s149_s15 = sshll.u32 %s140_s9, 4  ;;  %p1197_p7 = pnand %p925_p10, %p46_p9  ;;  %s150_s15 = int_to_ptr.vmem [resolvable:$true] %s149_s15 }
  0x23   : > { %s137_s20 = scalar_lea.sflag [#allocation3], %s136_s30  ;;  %s1023_s21 = scalar_lea.vmem %s150_s15, 512 }
  0x24   : > { %p1012_p12 = pneg %p1197_p7  ;;  %p1024_p13 = scmp.ne.s32.totalorder %s150_s15, %s1023_s21 }
  0x25   : > { %s1097_s23 = smov [#allocation2]  }
  0x26   : > { %p1026_p0 = pnand %p1024_p13, %p1012_p12  ;;  %s1028_s24 = sshll.u32 %s1097_s23, 4  ;;  %s1029_s24 = int_to_ptr.vmem [resolvable:$false] %s1028_s24 }
  0x27   : > { %s1030_s25 = scalar_lea.vmem %s1029_s24, 1024  ;;  %p1031_p3 = scmp.lt.s32.totalorder %s150_s15, %s1029_s24 }
  0x28   : > { %p1027_p2 = pneg %p1026_p0  ;;  %p1032_p6 = scmp.lt.s32.totalorder %s1030_s25, %s1023_s21 }
  0x2a   : > { %p1033_p8 = por %p1032_p6, %p1031_p3 }
  0x2c   : > { %p1034_p9 = pnand %p1033_p8, %p1027_p2 }
  0x2e   : > { %1037 = shalt.err (!%p1034_p9)
}
  0x2f   : > { %s1098_s26 = smov 128   ;;  %s1099_s27 = smov 8  }
  0x30   : > { %923 = dma.hbm_to_vmem [thread:$0]  (!%p1197_p7), %s148_s8, 512, %s150_s15, %s137_s20, %s1098_s26, %s1098_s26, %s1099_s27  }
  0x31   : > { %161 = sbr.rel (%p1160_p5) target bundleno = 632 (0x278), region = 28  ;;  %s163_s28 = sand.u32 (!%p1160_p5), 1, %s1076_s10  }
  0x32   : > { %s823_s29 = sshll.u32 (!%p1160_p5), %s163_s28, 5  ;;  %s164_s30 = scalar_lea.sflag (!%p1160_p5), [#allocation3], %s163_s28 }
  0x33   : > { %s167_s3 = scalar_lea.vmem (!%p1160_p5), [#allocation2], %s823_s29 }
  0x36   : > { %1063 = dma.done.wait (%p1156_p4), %s164_s30, 512  }
  0x37   : > { %1065 = vsyncadd (%p1156_p4), %s164_s30, 4294966784 }
  0x38   : > { %1067 = dma.done.wait (%p1148_p1), [#allocation5], 128  }
  0x39   : > { %1069 = vsyncadd (%p1148_p1), [#allocation5], 4294967168  ;;  %v210_v0 = vld [vmem:[%s167_s3 + $0x10] sm:$0xff]  ;;  %v208_v1 = vld [vmem:[%s167_s3] sm:$0xff]  ;;  %s1100_s18 = smov 16   ;;  %s1101_s4 = smov 112  }
  0x3a   : > { %236 = vrot.lane.b32.xlu1 %v210_v0, %s1100_s18  ;;  %232 = vrot.lane.b32.xlu0 %v208_v1, %s1100_s18  ;;  %v211_v2 = vld [vmem:[%s167_s3 + $0x18] sm:$0xff]  ;;  %v209_v3 = vld [vmem:[%s167_s3 + $0x8] sm:$0xff]  ;;  %v1220_v4 = vld [vmem:[#allocation4] sm:$0xff]   ;;  %vm268_vm0 = vcmask 130048   ;;  %p198_p1 = scmp.lt.s32.totalorder %s1084_s12, 5  ;;  %vm657_vm1 = vcmask 64512  }
  0x3b   : > { %874 = vmatprep.subr.bf16.mxu0 %v1220_v4  ;;  %880 = vmatprep.subr.bf16.mxu1 %v1220_v4 }
  0x3c   : > { %875 = vmatpush3.bf16.msra.mxu0 %v1220_v4  ;;  %881 = vmatpush3.bf16.msra.mxu1 %v1220_v4  ;;  %s1333_s12 = smov (!%p198_p1, %s1084_s12), 5 }
  0x3d   : > { %886 = vmatprep.subr.bf16.mxu0 %v1220_v4  ;;  %892 = vmatprep.subr.bf16.mxu1 %v1220_v4  ;;  %s855_s16 = sshll.u32 %s1333_s12, 7  ;;  %s1102_s12 = smov 120  }
  0x3e   : > { %238 = vrot.lane.b32.xlu1 %v211_v2, %s1100_s18  ;;  %234 = vrot.lane.b32.xlu0 %v209_v3, %s1100_s18  ;;  %s1257_s7 = scalar_lea.vmem %s1319_s2, %s855_s16 }
  0x42   : > { %218 = vrot.lane.b32.xlu1 %v209_v3, %s1101_s4  ;;  %216 = vrot.lane.b32.xlu0 %v208_v1, %s1101_s4 }
  0x46   : > { %222 = vrot.lane.b32.xlu1 %v211_v2, %s1101_s4  ;;  %220 = vrot.lane.b32.xlu0 %v210_v0, %s1101_s4 }
  0xac   : > { %v237_v5 = vpop.permute.xlu1 %236  ;;  %v233_v6 = vpop.permute.xlu0 %232 }
  0xad   : > { %v246_v9 = vsub.f32 %v210_v0, %v237_v5  ;;  %v244_v10 = vsub.f32 %v208_v1, %v233_v6 }
  0xb0   : > { %v239_v7 = vpop.permute.xlu1 %238  ;;  %v235_v8 = vpop.permute.xlu0 %234 }
  0xb1   : > { %v247_v11 = vsub.f32 %v211_v2, %v239_v7  ;;  %v245_v12 = vsub.f32 %v209_v3, %v235_v8 }
  0xb3   : > { %v449_v13 = vpack.c.bf16 %v247_v11, %v246_v9  ;;  %v448_v14 = vpack.c.bf16 %v245_v12, %v244_v10 }
  0xb4   : > { %v219_v15 = vpop.permute.xlu1 %218  ;;  %v217_v16 = vpop.permute.xlu0 %216 }
  0xb5   : > { %v452_v17 = vunpack.c.l.bf16 %v449_v13  ;;  %v453_v18 = vunpack.c.h.bf16 %v449_v13  ;;  %v450_v19 = vunpack.c.l.bf16 %v448_v14  ;;  %v451_v20 = vunpack.c.h.bf16 %v448_v14 }
  0xb6   : > { %v229_v21 = vadd.f32 %v219_v15, %v209_v3  ;;  %v228_v22 = vadd.f32 %v217_v16, %v208_v1 }
  0xb7   : > { %v457_v23 = vsub.f32 %v247_v11, %v453_v18  ;;  %v455_v24 = vsub.f32 %v245_v12, %v451_v20  ;;  %v456_v25 = vsub.f32 %v246_v9, %v452_v17  ;;  %v454_v26 = vsub.f32 %v244_v10, %v450_v19 }
  0xb8   : > { %v250_v27 = vpack.c.bf16 %v229_v21, %v228_v22  ;;  %v223_v28 = vpop.permute.xlu1 %222  ;;  %v221_v29 = vpop.permute.xlu0 %220 }
  0xb9   : > { %v459_v30 = vpack.c.bf16 %v457_v23, %v456_v25  ;;  %v458_v31 = vpack.c.bf16 %v455_v24, %v454_v26  ;;  %v231_v32 = vadd.f32 %v223_v28, %v211_v2  ;;  %v230_v33 = vadd.f32 %v221_v29, %v210_v0 }
  0xba   : > { %v252_v34 = vunpack.c.l.bf16 %v250_v27  ;;  %v253_v35 = vunpack.c.h.bf16 %v250_v27  ;;  %882 = vmatprep.mubr.msk.bf16.mxu1 %vm268_vm0, %v250_v27 }
  0xbb   : > { %464 = vrot.lane.b32.xlu1 %v459_v30, %s1101_s4  ;;  %462 = vrot.lane.b32.xlu0 %v458_v31, %s1101_s4  ;;  %v584_v36 = vunpack.c.l.bf16 %v459_v30  ;;  %v585_v37 = vunpack.c.h.bf16 %v459_v30  ;;  %v582_v38 = vunpack.c.l.bf16 %v458_v31  ;;  %v583_v39 = vunpack.c.h.bf16 %v458_v31 }
  0xbc   : > { %v256_v40 = vsub.f32 %v228_v22, %v252_v34  ;;  %v251_v41 = vpack.c.bf16 %v231_v32, %v230_v33  ;;  %v257_v42 = vsub.f32 %v229_v21, %v253_v35 }
  0xbd   : > { %v588_v43 = vsub.f32 %v456_v25, %v584_v36  ;;  %v589_v44 = vsub.f32 %v457_v23, %v585_v37  ;;  %v586_v45 = vsub.f32 %v454_v26, %v582_v38  ;;  %v587_v46 = vsub.f32 %v455_v24, %v583_v39 }
  0xbe   : > { %v254_v47 = vunpack.c.l.bf16 %v251_v41  ;;  %v255_v48 = vunpack.c.h.bf16 %v251_v41  ;;  %v260_v49 = vpack.c.bf16 %v257_v42, %v256_v40  ;;  %883 = vmatmul.mubr.msk.bf16.vlgmr.msra.gmra.mxu1 %vm268_vm0, %v251_v41 }
  0xbf   : > { %525 = vrot.lane.b32.xlu1 %v449_v13, %s1101_s4  ;;  %523 = vrot.lane.b32.xlu0 %v448_v14, %s1101_s4  ;;  %v591_v54 = vpack.c.bf16 %v589_v44, %v588_v43  ;;  %v590_v55 = vpack.c.bf16 %v587_v46, %v586_v45 }
  0xc0   : > { %v258_v50 = vsub.f32 %v230_v33, %v254_v47  ;;  %v259_v51 = vsub.f32 %v231_v32, %v255_v48  ;;  %876 = vmatprep.mubr.msk.bf16.mxu0 %vm268_vm0, %v260_v49  ;;  %v379_v52 = vunpack.c.l.bf16 %v260_v49  ;;  %v380_v53 = vunpack.c.h.bf16 %v260_v49  ;;  %893 = vmatpush3.bf16.msra.mxu1 %v1220_v4 }
  0xc1   : > { %904 = vmatprep.subr.bf16.mxu1 %v1220_v4 }
  0xc2   : > { %v261_v56 = vpack.c.bf16 %v259_v51, %v258_v50  ;;  %v384_v57 = vsub.f32 %v257_v42, %v380_v53  ;;  %v383_v58 = vsub.f32 %v256_v40, %v379_v52 }
  0xc3   : > { %596 = vrot.lane.b32.xlu1 %v591_v54, %s1101_s4  ;;  %594 = vrot.lane.b32.xlu0 %v590_v55, %s1101_s4 }
  0xc4   : > { %v381_v59 = vunpack.c.l.bf16 %v261_v56  ;;  %v382_v60 = vunpack.c.h.bf16 %v261_v56  ;;  %877 = vmatmul.mubr.msk.bf16.vlgmr.msra.gmra.mxu0 %vm268_vm0, %v261_v56  ;;  %v387_v61 = vpack.c.bf16 %v384_v57, %v383_v58 }
  0xc5   : > { %887 = vmatpush3.bf16.msra.mxu0 %v1220_v4 }
  0xc6   : > { %v385_v62 = vsub.f32 %v258_v50, %v381_v59  ;;  %v386_v63 = vsub.f32 %v259_v51, %v382_v60  ;;  %888 = vmatprep.mubr.msk.bf16.mxu0 %vm268_vm0, %v387_v61  ;;  %898 = vmatprep.subr.bf16.mxu0 %v1220_v4 }
  0xc8   : > { %v388_v0 = vpack.c.bf16 %v386_v63, %v385_v62 }
  0xcc   : > { %889 = vmatmul.mubr.msk.bf16.vlgmr.msra.gmra.mxu0 %vm268_vm0, %v388_v0 }
  0xcd   : > { %899 = vmatpush3.bf16.msra.mxu0 %v1220_v4 }
 0x12d   : > { %v465_v1 = vpop.permute.xlu1 %464  ;;  %v463_v2 = vpop.permute.xlu0 %462 }
 0x12e   : > { %894 = vmatprep.mubr.msk.bf16.mxu1 %vm268_vm0, %v463_v2 }
 0x12f   : > { %895 = vmatmul.mubr.msk.bf16.vlgmr.msra.gmra.mxu1 %vm268_vm0, %v465_v1 }
 0x130   : > { %905 = vmatpush3.bf16.msra.mxu1 %v1220_v4 }
 0x131   : > { %v526_v3 = vpop.permute.xlu1 %525  ;;  %v524_v5 = vpop.permute.xlu0 %523 }
 0x132   : > { %900 = vmatprep.mubr.msk.bf16.mxu0 %vm268_vm0, %v524_v5 }
 0x133   : > { %901 = vmatmul.mubr.msk.bf16.vlgmr.msra.gmra.mxu0 %vm268_vm0, %v526_v3 }
 0x135   : > { %v597_v6 = vpop.permute.xlu1 %596  ;;  %v595_v7 = vpop.permute.xlu0 %594 }
 0x136   : > { %906 = vmatprep.mubr.msk.bf16.mxu1 %vm268_vm0, %v595_v7 }
 0x137   : > { %907 = vmatmul.mubr.msk.bf16.vlgmr.msra.gmra.mxu1 %vm268_vm0, %v597_v6 }
 0x17e   : > { %v884_v8 = vpop.f32.mrf.mxu1 }
 0x180   : > { %v364_v11 = vpop.f32.mrf.mxu1 }
 0x182   : > { %v885_v14 = vpop.f32.mrf.mxu1 }
 0x184   : > { %v878_v9 = vpop.f32.mrf.mxu0  ;;  %v367_v17 = vpop.f32.mrf.mxu1 }
 0x185   : > { %v373_v4 = vadd.f32 %v884_v8, %v878_v9 }
 0x186   : > { %v309_v10 = vpop.f32.mrf.mxu0 }
 0x187   : > { %v365_v15 = vadd.f32 %v364_v11, %v309_v10 }
 0x188   : > { %v879_v12 = vpop.f32.mrf.mxu0 }
 0x189   : > { %v376_v19 = vadd.f32 %v885_v14, %v879_v12 }
 0x18a   : > { %v312_v13 = vpop.f32.mrf.mxu0 }
 0x18b   : > { %v368_v22 = vadd.f32 %v367_v17, %v312_v13 }
 0x18c   : > { %v890_v16 = vpop.f32.mrf.mxu0 }
 0x18d   : > { %v446_v18 = vadd.f32 %v890_v16, %v373_v4 }
 0x18e   : > { %v429_v20 = vpop.f32.mrf.mxu0 }
 0x18f   : > { %660 = vst.msk [vmem:[%s1257_s7 + $0x10] sm:$0xff] %vm657_vm1, %v446_v18  ;;  %v444_v21 = vadd.f32 %v429_v20, %v365_v15  ;;  %670 = vrot.lane.b32.xlu0 %v446_v18, %s1102_s12 }
 0x190   : > { %v891_v23 = vpop.f32.mrf.mxu0 }
 0x191   : > { %658 = vst.msk [vmem:[%s1257_s7] sm:$0xff] %vm657_vm1, %v444_v21  ;;  %v447_v24 = vadd.f32 %v891_v23, %v376_v19 }
 0x192   : > { %v432_v25 = vpop.f32.mrf.mxu0 }
 0x193   : > { %661 = vst.msk [vmem:[%s1257_s7 + $0x18] sm:$0xff] %vm657_vm1, %v447_v24  ;;  %672 = vrot.lane.b32.xlu1 %v447_v24, %s1102_s12  ;;  %v445_v26 = vadd.f32 %v432_v25, %v368_v22  ;;  %666 = vrot.lane.b32.xlu0 %v444_v21, %s1102_s12 }
 0x195   : > { %659 = vst.msk [vmem:[%s1257_s7 + $0x8] sm:$0xff] %vm657_vm1, %v445_v26 }
 0x197   : > { %668 = vrot.lane.b32.xlu1 %v445_v26, %s1102_s12 }
 0x1ef   : > { %v896_v27 = vpop.f32.mrf.mxu1 }
 0x1f1   : > { %v506_v28 = vpop.f32.mrf.mxu1 }
 0x1f3   : > { %v897_v29 = vpop.f32.mrf.mxu1  ;;  %v902_v30 = vpop.f32.mrf.mxu0 }
 0x1f4   : > { %v576_v33 = vadd.f32 %v902_v30, %v896_v27 }
 0x1f5   : > { %v509_v31 = vpop.f32.mrf.mxu1  ;;  %v567_v32 = vpop.f32.mrf.mxu0 }
 0x1f6   : > { %v568_v36 = vadd.f32 %v567_v32, %v506_v28 }
 0x1f7   : > { %v903_v34 = vpop.f32.mrf.mxu0  ;;  %v908_v35 = vpop.f32.mrf.mxu1 }
 0x1f8   : > { %v655_v37 = vadd.f32 %v908_v35, %v576_v33  ;;  %v579_v40 = vadd.f32 %v903_v34, %v897_v29 }
 0x1f9   : > { %v570_v38 = vpop.f32.mrf.mxu0  ;;  %v638_v39 = vpop.f32.mrf.mxu1 }
 0x1fa   : > { %846 = vst.msk [vmem:[%s1257_s7 + $0x50] sm:$0xff] %vm657_vm1, %v655_v37  ;;  %v653_v41 = vadd.f32 %v638_v39, %v568_v36  ;;  %v571_v43 = vadd.f32 %v570_v38, %v509_v31 }
 0x1fb   : > { %v909_v42 = vpop.f32.mrf.mxu1 }
 0x1fc   : > { %844 = vst.msk [vmem:[%s1257_s7 + $0x40] sm:$0xff] %vm657_vm1, %v653_v41  ;;  %v656_v44 = vadd.f32 %v909_v42, %v579_v40  ;;  %692 = vrot.lane.b32.xlu0 %v653_v41, %s1102_s12 }
 0x1fd   : > { %v641_v45 = vpop.f32.mrf.mxu1 }
 0x1fe   : > { %847 = vst.msk [vmem:[%s1257_s7 + $0x58] sm:$0xff] %vm657_vm1, %v656_v44  ;;  %v654_v46 = vadd.f32 %v641_v45, %v571_v43 }
 0x200   : > { %845 = vst.msk [vmem:[%s1257_s7 + $0x48] sm:$0xff] %vm657_vm1, %v654_v46  ;;  %696 = vrot.lane.b32.xlu0 %v655_v37, %s1102_s12  ;;  %694 = vrot.lane.b32.xlu1 %v654_v46, %s1102_s12 }
 0x201   : > { %v671_v47 = vpop.permute.xlu0 %670 }
 0x202   : > { %842 = vst.msk [vmem:[%s1257_s7 + $0x30] sm:$0xff] %vm657_vm1, %v671_v47 }
 0x204   : > { %698 = vrot.lane.b32.xlu1 %v656_v44, %s1102_s12 }
 0x205   : > { %v673_v48 = vpop.permute.xlu1 %672  ;;  %v667_v49 = vpop.permute.xlu0 %666 }
 0x206   : > { %843 = vst.msk [vmem:[%s1257_s7 + $0x38] sm:$0xff] %vm657_vm1, %v673_v48  ;;  %840 = vst.msk [vmem:[%s1257_s7 + $0x20] sm:$0xff] %vm657_vm1, %v667_v49 }
 0x209   : > { %v669_v50 = vpop.permute.xlu1 %668 }
 0x20a   : > { %841 = vst.msk [vmem:[%s1257_s7 + $0x28] sm:$0xff] %vm657_vm1, %v669_v50 }
 0x26e   : > { %v693_v51 = vpop.permute.xlu0 %692 }
 0x26f   : > { %848 = vst.msk [vmem:[%s1257_s7 + $0x60] sm:$0xff] %vm657_vm1, %v693_v51 }
 0x272   : > { %v695_v52 = vpop.permute.xlu1 %694  ;;  %v697_v53 = vpop.permute.xlu0 %696 }
 0x273   : > { %849 = vst.msk [vmem:[%s1257_s7 + $0x68] sm:$0xff] %vm657_vm1, %v695_v52  ;;  %850 = vst.msk [vmem:[%s1257_s7 + $0x70] sm:$0xff] %vm657_vm1, %v697_v53 }
 0x276   : > { %v699_v54 = vpop.permute.xlu1 %698 }
 0x277   : > { %851 = vst.msk [vmem:[%s1257_s7 + $0x78] sm:$0xff] %vm657_vm1, %v699_v54 }
 0x278 PF: > { %s16_s14 = sadd.s32 1, %s1092_s14   ;;  %s1325_s9 = smov %s1076_s10 }
 0x279   : > { %p13_p4 = scmp.ge.s32.totalorder %s16_s14, 8   ;;  %s1326_s10 = smov %s1080_s11 }
 0x27a   : > { %s1327_s11 = smov %s1192_s5  ;;  %s1328_s12 = smov %s1088_s13 }
 0x27b   : > { %s1329_s13 = smov %s1331_s22  ;;  %15 = sbr.rel (!%p13_p4) target bundleno = 5 (0x5), region = 75 }
 0x280   :  { %739 = vsyncpa [#allocation3], 1 }
 0x281   :  { %741 = vsyncpa [#allocation3 + $0x1], 1 }
 0x282   :  { %742 = vsyncpa [#allocation5], 1 }

</bundles_post_ra>
